<compile_context>
chip_gen: v7x
topology: tpu7x:2x2x1
jax: 0.10.0
libtpu: 0.0.40
codegen_flags: <defaults>
</compile_context>

<pallas_src>
import functools

import jax
import jax.numpy as jnp
from jax.experimental import pallas as pl
from jax.experimental.pallas import tpu as pltpu


def _gather_rows_kernel(ids_ref, w_hbm, out_ref, sem):
    """Gather `tm` rows of the combined embedding table into the output block.

    ids_ref : SMEM (N_pad,) int32 token ids (scalar prefetch)
    w_hbm   : HBM  (V, D_pad) combined embedding table (memory_space=pl.ANY)
    out_ref : VMEM (tm, D_pad) pipelined output block for this grid step
    sem     : DMA semaphore, shape (1,), shared by all row copies of this step
    """
    tm = out_ref.shape[0]
    vmax = w_hbm.shape[0] - 1
    base = pl.program_id(0) * tm

    # Issue all row gathers (HBM table row -> VMEM output row).  They proceed
    # concurrently in the DMA engine; we only need them all complete before the
    # body ends (the grid pipeline then DMAs the whole block back to HBM).
    @pl.loop(0, tm)
    def _start(r):
        tok = jnp.clip(ids_ref[base + r], 0, vmax)   # guard OOB / padded ids
        pltpu.make_async_copy(
            w_hbm.at[pl.ds(tok, 1), :],
            out_ref.at[pl.ds(r, 1), :],
            sem.at[0],
        ).start()

    # tm matching-size waits on the single shared semaphore == "all copies done".
    @pl.loop(0, tm)
    def _wait(r):
        pltpu.make_async_copy(
            w_hbm.at[pl.ds(0, 1), :],                # shape-only descriptor
            out_ref.at[pl.ds(r, 1), :],
            sem.at[0],
        ).wait()


def prepare_combined_table(pretrained_tables, trainable_table):
    """One-time parameter prep (== module __init__): feature-concat all tables.

    stack(dim=-2)+flatten(-2,-1) of the per-encoder embeddings followed by
    torch.cat([., trainable], -1) is exactly a row lookup of this table.
    Returns (w_all, d_out): table (V, D_pad) with the feature axis padded to a
    multiple of 128 lanes, plus the true output width d_out.
    """
    L, V, Dp = pretrained_tables.shape
    Vt, Dt = trainable_table.shape
    assert V == Vt
    d_out = L * Dp + Dt
    w_all = jnp.concatenate(
        [pretrained_tables[i] for i in range(L)] + [trainable_table], axis=-1
    ).astype(jnp.float32)
    d_pad = ((d_out + 127) // 128) * 128
    if d_pad != d_out:
        w_all = jnp.pad(w_all, ((0, 0), (0, d_pad - d_out)))
    return w_all, d_out


@functools.partial(jax.jit, static_argnames=("d_out", "tm"))
def gia_word_embedding_forward(x_ids, w_all, *, d_out, tm=128):
    """x_ids: (B, S) int token ids; w_all: (V, D_pad) from prepare_combined_table.

    tm = tokens gathered per grid step (multiple of 8).  128-512 works well for
    realistic batch*seq: it amortizes the ~0.35 us/step grid overhead while the
    double-buffered output block (2 * tm * D_pad * 4 B) stays far below the
    64 MiB v7x VMEM budget.  Ids live in SMEM (~4*B*S bytes), fine for any
    practical B*S.
    """
    assert tm % 8 == 0, "tm must be a multiple of 8 (sublane alignment)"
    V, d_pad = w_all.shape
    B, S = x_ids.shape
    N = B * S
    n_pad = ((N + tm - 1) // tm) * tm

    ids = x_ids.reshape(N).astype(jnp.int32)
    if n_pad != N:
        ids = jnp.pad(ids, (0, n_pad - N))           # pad ids -> rows sliced off

    out = pl.pallas_call(
        _gather_rows_kernel,
        out_shape=jax.ShapeDtypeStruct((n_pad, d_pad), jnp.float32),
        grid_spec=pltpu.PrefetchScalarGridSpec(
            num_scalar_prefetch=1,                        # ids -> SMEM
            grid=(n_pad // tm,),
            in_specs=[pl.BlockSpec(memory_space=pl.ANY)],  # table stays in HBM
            out_specs=pl.BlockSpec((tm, d_pad), lambda i, ids: (i, 0)),
            scratch_shapes=[pltpu.SemaphoreType.DMA((1,))],
        ),
        compiler_params=pltpu.CompilerParams(
            dimension_semantics=("parallel",),
        ),
    )(ids, w_all)

    if n_pad != N:
        out = out[:N]
    if d_pad != d_out:
        out = out[:, :d_out]
    return out.reshape(B, S, d_out)


if __name__ == "__main__":
    # --- config consistent with the module's __init__ assertions -------------
    vocab_size = 32
    hidden_size = 32
    embeddingListLen = 2                     # L pretrained vector spaces
    trainableEmbeddingSpaceFraction = 2      # trainableHiddenSize = hidden // frac
    pad_token_id = 1
    batch, seq = 2, 8

    Dp = hidden_size // embeddingListLen                 # 16 per pretrained encoder
    Dt = hidden_size // trainableEmbeddingSpaceFraction  # 16 trainable

    key = jax.random.PRNGKey(0)
    k_pre, k_tr, k_ids = jax.random.split(key, 3)

    # deterministic "pretrained" embedding tables
    pretrained_tables = jax.random.normal(
        k_pre, (embeddingListLen, vocab_size, Dp), dtype=jnp.float32
    )
    # trainable nn.Embedding(vocab, Dt, padding_idx=pad_token_id): pad row zero
    trainable_table = jax.random.normal(k_tr, (vocab_size, Dt), dtype=jnp.float32)
    trainable_table = trainable_table.at[pad_token_id].set(0.0)

    # token ids (include some pad tokens)
    x = jax.random.randint(k_ids, (batch, seq), 0, vocab_size, dtype=jnp.int32)
    x = x.at[:, -1].set(pad_token_id)

    # One-time parameter prep (module __init__), then the gather-only forward.
    w_all, d_out = prepare_combined_table(pretrained_tables, trainable_table)
    w_all = jax.block_until_ready(w_all)

    # tm=8 at these tiny demo shapes so the grid still has 2 steps;
    # use tm=128..512 for realistic batch*seq.
    out = gia_word_embedding_forward(x, w_all, d_out=d_out, tm=8)
    out = jax.block_until_ready(out)

    # pure-JAX reference of the PyTorch forward
    ref_pre = jnp.take(pretrained_tables, x, axis=1)        # (L, B, S, Dp)
    ref_pre = jnp.moveaxis(ref_pre, 0, 2)                   # (B, S, L, Dp) == stack dim=-2
    ref_pre = ref_pre.reshape(batch, seq, embeddingListLen * Dp)  # flatten(-2,-1)
    ref_tr = jnp.take(trainable_table, x, axis=0)           # (B, S, Dt)
    ref = jnp.concatenate([ref_pre, ref_tr], axis=-1)

    assert out.shape == (batch, seq, hidden_size + Dt), out.shape
    assert jnp.array_equal(out, ref), "mismatch vs reference"
    print("KERNEL_OK")
</pallas_src>

<mosaic_0001>
module attributes {stable_mosaic.version = 11 : i64} {
  func.func @_gather_rows_kernel(%arg0: i32, %arg1: memref<16xi32, #tpu.memory_space<smem>>, %arg2: memref<32x128xf32, #tpu.memory_space<any>>, %arg3: memref<8x128xf32, #tpu.memory_space<vmem>>, %arg4: memref<1x!tpu.dma_semaphore, #tpu.memory_space<semaphore_mem>>) attributes {dimension_semantics = [#tpu.dimension_semantics<parallel>], iteration_bounds = array<i64: 2>, scalar_prefetch = 1 : i64, scratch_operands = 1 : i64, tpu.core_type = #tpu.core_type<tc>, window_params = [{}, {transform_indices = @transform_1, window_bounds = array<i64: 8, 128>}]} {
    %c8_i32 = arith.constant 8 : i32
    %0 = arith.muli %arg0, %c8_i32 : i32
    %c0_i32 = arith.constant 0 : i32
    %c8_i32_0 = arith.constant 8 : i32
    %1 = arith.addi %c0_i32, %c8_i32_0 : i32
    %c1_i32 = arith.constant 1 : i32
    scf.for %arg5 = %c0_i32 to %1 step %c1_i32  : i32 {
      %c1_i32_6 = arith.constant 1 : i32
      %3 = arith.muli %arg5, %c1_i32_6 : i32
      %c0_i32_7 = arith.constant 0 : i32
      %4 = arith.addi %c0_i32_7, %3 : i32
      %5 = arith.addi %0, %4 : i32
      %6 = arith.index_cast %5 : i32 to index
      %7 = memref.load %arg1[%6] : memref<16xi32, #tpu.memory_space<smem>>
      %c0_i32_8 = arith.constant 0 : i32
      %c31_i32 = arith.constant 31 : i32
      %8 = arith.maxsi %c0_i32_8, %7 : i32
      %9 = arith.minsi %c31_i32, %8 : i32
      %c0_i32_9 = arith.constant 0 : i32
      %c0_i32_10 = arith.constant 0 : i32
      %10 = tpu.memref_slice %arg2[%9, %c0_i32_10] : memref<32x128xf32, #tpu.memory_space<any>> -> memref<1x128xf32, #tpu.memory_space<any>>
      %c0_i32_11 = arith.constant 0 : i32
      %11 = tpu.memref_slice %arg3[%4, %c0_i32_11] : memref<8x128xf32, #tpu.memory_space<vmem>> -> memref<1x128xf32, #tpu.memory_space<vmem>>
      %12 = tpu.memref_slice %arg4[%c0_i32_9] : memref<1x!tpu.dma_semaphore, #tpu.memory_space<semaphore_mem>> -> memref<1x!tpu.dma_semaphore, #tpu.memory_space<semaphore_mem>>
      %13 = tpu.memref_squeeze %12 : memref<1x!tpu.dma_semaphore, #tpu.memory_space<semaphore_mem>> -> memref<!tpu.dma_semaphore, #tpu.memory_space<semaphore_mem>>
      tpu.enqueue_dma source(%10 : memref<1x128xf32, #tpu.memory_space<any>>) target(%11 : memref<1x128xf32, #tpu.memory_space<vmem>>) target_semaphore(%13 : memref<!tpu.dma_semaphore, #tpu.memory_space<semaphore_mem>>)
    }
    %c8_i32_1 = arith.constant 8 : i32
    %c0_i32_2 = arith.constant 0 : i32
    %c8_i32_3 = arith.constant 8 : i32
    %2 = arith.addi %c0_i32_2, %c8_i32_3 : i32
    %c1_i32_4 = arith.constant 1 : i32
    scf.for %arg5 = %c0_i32_2 to %2 step %c1_i32_4  : i32 {
      %c1_i32_6 = arith.constant 1 : i32
      %3 = arith.muli %arg5, %c1_i32_6 : i32
      %c0_i32_7 = arith.constant 0 : i32
      %4 = arith.addi %c0_i32_7, %3 : i32
      %c0_i32_8 = arith.constant 0 : i32
      %c0_i32_9 = arith.constant 0 : i32
      %c0_i32_10 = arith.constant 0 : i32
      %5 = tpu.memref_slice %arg2[%c0_i32_9, %c0_i32_10] : memref<32x128xf32, #tpu.memory_space<any>> -> memref<1x128xf32, #tpu.memory_space<any>>
      %c0_i32_11 = arith.constant 0 : i32
      %6 = tpu.memref_slice %arg3[%4, %c0_i32_11] : memref<8x128xf32, #tpu.memory_space<vmem>> -> memref<1x128xf32, #tpu.memory_space<vmem>>
      %7 = tpu.memref_slice %arg4[%c0_i32_8] : memref<1x!tpu.dma_semaphore, #tpu.memory_space<semaphore_mem>> -> memref<1x!tpu.dma_semaphore, #tpu.memory_space<semaphore_mem>>
      %8 = tpu.memref_squeeze %7 : memref<1x!tpu.dma_semaphore, #tpu.memory_space<semaphore_mem>> -> memref<!tpu.dma_semaphore, #tpu.memory_space<semaphore_mem>>
      tpu.wait_dma2 semaphore(%8 : memref<!tpu.dma_semaphore, #tpu.memory_space<semaphore_mem>>) src(%5 : memref<1x128xf32, #tpu.memory_space<any>>) dst(%6 : memref<1x128xf32, #tpu.memory_space<vmem>>)
    }
    %c8_i32_5 = arith.constant 8 : i32
    return
  }
  func.func @transform_1(%arg0: i32, %arg1: memref<16xi32, #tpu.memory_space<smem>>) -> (i32, i32) {
    %c0_i32 = arith.constant 0 : i32
    %c0_i32_0 = arith.constant 0 : i32
    return %arg0, %c0_i32 : i32, i32
  }
}

</mosaic_0001>

<bundles_post_ra>
// kernel: gia_word_embedding_forward.1
= control target key start
LH: loop header
LB: loop body
LE: loop exit
PB: predicated region body
PF: predicated region fallthrough
CT: control target
= control target key end

     0   :  { %s312_s0 = inlined_call_operand.vmem [shape: s32[16], index: 0, kind: input, shape index: {}]   ;;  %s313_s1 = inlined_call_operand.hbm [shape: f32[32,128], index: 1, kind: input, shape index: {}]   ;;  %s314_s2 = inlined_call_operand.vmem [shape: f32[16,128], index: 2, kind: output, shape index: {}]  }
   0x1   :  { %s7_s11 = sshll.u32 %s312_s0, 4  ;;  %s8_s11 = int_to_ptr.vmem [resolvable:$true] %s7_s11 }
   0x2   :  { %s187_s12 = scalar_lea.vmem %s8_s11, 16  ;;  %p192_p1 = scmp.lt.s32.totalorder %s8_s11, %s8_s11 }
   0x3   :  { %p188_p0 = scmp.ne.s32.totalorder %s8_s11, %s187_s12  ;;  %p193_p2 = scmp.lt.s32.totalorder %s187_s12, %s187_s12 }
   0x5   :  { %p194_p3 = por %p193_p2, %p192_p1 }
   0x7   :  { %p195_p4 = pnand %p194_p3, %p188_p0 }
   0x9   :  { %198 = shalt.err (!%p195_p4)  }
   0xa   :  { %s251_s13 = smov [#allocation4]  }
   0xb   :  { %10 = dma.vmem_to_smem %s8_s11, 16, %s251_s13, [#allocation3] }
   0xc   :  { %235 = dma.done.wait [#allocation3], 16 }
   0xd   :  { %236 = vsyncadd [#allocation3], 4294967280 }
   0xe   :  { %12 = sfence }
   0xf   :  { %s270_s14 = smov 0  }
  0x10 LB: > { %p148_p5 = scmp.ge.s32.totalorder %s241_s14, 2  ;;  %s241_s14 = sphi %s270_s14, %s18_s14  }
  0x11   : > { %p50_p6 = scmp.lt.s32.totalorder (!%p148_p5), %s241_s14, 1  ;;  %s150_s0 = sshll.u32 (!%p148_p5), %s241_s14, 3 }
  0x12   : > { %43 = sbr.rel (%p148_p5) target bundleno = 83 (0x53), region = 12  ;;  %s284_s20 = smov (!%p148_p5), 0  }
  0x19   : > { %s51_s15 = scalar_select %p50_p6, %s241_s14, 1 }
  0x1b   : > { %s149_s16 = sshll.u32 %s51_s15, 3 }
  0x1c   : > { %s282_s19 = scalar_lea.vmem %s314_s2, %s149_s16 }
  0x1d LB: >> { %s61_s21 = sadd.s32 %s245_s20, %s150_s0  ;;  %s69_s23 = scalar_lea.vmem %s282_s19, %s245_s20  ;;  %s245_s20 = sphi %s284_s20, %s60_s20  }
  0x1e   : >> { %s62_s22 = sld [smem:[#allocation4 + %s61_s21]]  ;;  %s77_s24 = sshll.u32 %s69_s23, 4  ;;  %s78_s24 = int_to_ptr.vmem [resolvable:$true] %s77_s24 }
  0x1f   : >> { %s201_s4 = scalar_lea.hbm %s313_s1, 512 }
  0x24   : >> { %p63_p7 = scmp.gt.s32.totalorder %s62_s22, 0  ;;  %p151_p8 = scmp.lt.s32.totalorder %s62_s22, 31 }
  0x26   : >> { %s316_s22 = smov (!%p63_p7, %s62_s22), 0 }
  0x27   : >> { %s318_s22 = smov (!%p151_p8, %s316_s22), 31 }
  0x28   : >> { %s156_s25 = sshll.u32 %s318_s22, 4 }
  0x29   : >> { %s68_s28 = scalar_lea.hbm %s313_s1, %s156_s25 }
  0x2a   : >> { %s199_s29 = scalar_lea.hbm %s68_s28, 16  ;;  %p202_p10 = scmp.lt.u32.totalorder %s68_s28, %s313_s1 }
  0x2b   : >> { %p200_p9 = scmp.ne.s32.totalorder %s68_s28, %s199_s29  ;;  %p203_p11 = scmp.lt.u32.totalorder %s201_s4, %s199_s29 }
  0x2c   : >> { %p205_p13 = scmp.lt.u32.totalorder %s199_s29, %s68_s28 }
  0x2d   : >> { %p204_p12 = por %p203_p11, %p202_p10 }
  0x2f   : >> { %p206_p0 = por %p205_p13, %p204_p12 }
  0x31   : >> { %p207_p1 = pnand %p206_p0, %p200_p9 }
  0x33   : >> { %210 = shalt.err (!%p207_p1)  }
  0x34   : >> { %s211_s7 = scalar_lea.vmem %s78_s24, 16  ;;  %s213_s10 = sshll.u32 %s314_s2, 4  ;;  %s214_s10 = int_to_ptr.vmem [resolvable:$false] %s213_s10 }
  0x35   : >> { %p212_p2 = scmp.ne.s32.totalorder %s78_s24, %s211_s7  ;;  %s215_s11 = scalar_lea.vmem %s214_s10, 256 }
  0x36   : >> { %p216_p3 = scmp.lt.s32.totalorder %s78_s24, %s214_s10  ;;  %p217_p4 = scmp.lt.s32.totalorder %s215_s11, %s211_s7 }
  0x38   : >> { %p218_p5 = por %p217_p4, %p216_p3 }
  0x3a   : >> { %p219_p6 = pnand %p218_p5, %p212_p2 }
  0x3c   : >> { %222 = shalt.err (!%p219_p6)  }
  0x3d   : >> { %80 = dma.hbm_to_vmem [thread:$0]  %s68_s28, 16, %s78_s24, [#allocation2] }
  0x3e   : >> { %s60_s20 = sadd.s32 1, %s245_s20  }
  0x3f   : >> { %p57_p7 = scmp.ge.s32.totalorder %s60_s20, 8  }
  0x40   : > { %s247_s12 = smov (%p57_p7), 0  }
  0x41   : > { %59 = sbr.rel (!%p57_p7) target bundleno = 29 (0x1d), region = 59 }
  0x48 LB: >> { %237 = dma.done.wait [#allocation2], 16  ;;  %s249_s12 = sphi %s247_s12, %s86_s12  }
  0x49   : >> { %238 = vsyncadd [#allocation2], 4294967280  ;;  %s86_s12 = sadd.s32 1, %s249_s12  }
  0x4a   : >> { %p83_p8 = scmp.ge.s32.totalorder %s86_s12, 8  }
  0x4c   : > { %85 = sbr.rel (!%p83_p8) target bundleno = 72 (0x48), region = 70 }
  0x53 PF: > { %s18_s14 = sadd.s32 1, %s241_s14  }
  0x54   : > { %p15_p9 = scmp.ge.s32.totalorder %s18_s14, 3  }
  0x56   :  { %17 = sbr.rel (!%p15_p9) target bundleno = 16 (0x10), region = 81 }
  0x5d   :  { %109 = vsyncmov [#allocation2] }
  0x60   :  { %s110_s13 = vpop.sfrf %109 }
  0x61   :  { %p159_p10 = scmp.ne.s32.totalorder %s110_s13, 0 }
  0x63   :  { %114 = shalt.err (%p159_p10)  }

</bundles_post_ra>
